<compile_context>
chip_gen: v5e
topology: v5e:2x2
jax: 0.10.0
libtpu: 0.0.40
codegen_flags: <defaults>
</compile_context>

<pallas_src>
import functools

import jax
import jax.numpy as jnp
from jax.experimental import pallas as pl
from jax.experimental.pallas import tpu as pltpu

_LANES = 128
_ROW_ALIGN = 32  # int8 sublane packing prefers multiples of 32 rows


def _focal_loss_kernel(logits_ref, label_ref, out_ref, *, alpha, gamma, n, block_rows):
    i = pl.program_id(0)

    x = logits_ref[...]                        # (block_rows, 128) f32
    labf = label_ref[...].astype(jnp.float32)  # (block_rows, 128) int8 -> f32
    is_pos = labf != 0.0

    # Validity mask from the global flat element index (covers the tail pad and
    # any ragged last block).
    base = i * (block_rows * _LANES)
    row_ids = jax.lax.broadcasted_iota(jnp.int32, (block_rows, _LANES), 0)
    col_ids = jax.lax.broadcasted_iota(jnp.int32, (block_rows, _LANES), 1)
    valid = (base + row_ids * _LANES + col_ids) < n

    sig = jax.nn.sigmoid(x)
    p = jnp.where(is_pos, sig, 1.0 - sig) + 1e-10
    a = jnp.where(is_pos, jnp.float32(alpha), jnp.float32(1.0 - alpha))

    one_m_p = 1.0 - p
    gi = int(gamma)
    if float(gamma) == float(gi) and 0 <= gi <= 8:
        # Integer gamma: repeated VPU multiply — no extra transcendentals, and it
        # matches torch.pow for the (tiny) negative bases that 1-p can produce.
        w = one_m_p if gi >= 1 else jnp.ones_like(p)
        for _ in range(max(gi - 1, 0)):
            w = w * one_m_p
    else:
        w = jnp.power(jnp.maximum(one_m_p, 0.0), jnp.float32(gamma))

    loss = -a * w * jnp.log(p)
    loss = jnp.where(valid, loss, 0.0)

    # Per-(sublane, lane) partial sums: pure VPU adds, no cross-lane collapse
    # in-kernel and no carried accumulator (grid axis stays "parallel").
    out_ref[0] = loss.reshape(block_rows // 8, 8, _LANES).sum(axis=0)


def binary_focal_loss_logits(logits, label, alpha=0.25, gamma=2.0, *, block_rows=4096):
    """Mean binary focal loss over all elements of `logits` / `label`."""
    n = int(logits.size)
    rows = pl.cdiv(n, _LANES)
    rows_padded = pl.cdiv(rows, _ROW_ALIGN) * _ROW_ALIGN

    block_rows = max(_ROW_ALIGN, min(int(block_rows), rows_padded))
    block_rows = (block_rows // _ROW_ALIGN) * _ROW_ALIGN
    num_blocks = pl.cdiv(rows_padded, block_rows)

    pad = rows_padded * _LANES - n

    lf = logits.reshape(-1)
    if lf.dtype != jnp.float32:
        lf = lf.astype(jnp.float32)
    lb = label.reshape(-1).astype(jnp.int8)
    if pad:  # only materialize a copy when a tail pad is actually required
        lf = jnp.pad(lf, (0, pad))
        lb = jnp.pad(lb, (0, pad))
    lf = lf.reshape(rows_padded, _LANES)
    lb = lb.reshape(rows_padded, _LANES)

    kern = functools.partial(
        _focal_loss_kernel,
        alpha=float(alpha),
        gamma=float(gamma),
        n=n,
        block_rows=block_rows,
    )

    partials = pl.pallas_call(
        kern,
        out_shape=jax.ShapeDtypeStruct((num_blocks, 8, _LANES), jnp.float32),
        grid_spec=pltpu.PrefetchScalarGridSpec(
            num_scalar_prefetch=0,
            grid=(num_blocks,),
            in_specs=[
                pl.BlockSpec((block_rows, _LANES), lambda i: (i, 0)),
                pl.BlockSpec((block_rows, _LANES), lambda i: (i, 0)),
            ],
            out_specs=pl.BlockSpec((1, 8, _LANES), lambda i: (i, 0, 0)),
        ),
        compiler_params=pltpu.CompilerParams(
            dimension_semantics=("parallel",),
        ),
    )(lf, lb)

    # Tiny cross-block / cross-lane reduction and the mean are finished in JAX.
    return jnp.sum(partials) / jnp.float32(n)


if __name__ == "__main__":
    ALPHA, GAMMA = 0.25, 2.0  # deterministic "module params"

    key = jax.random.PRNGKey(0)
    k1, k2 = jax.random.split(key)
    logits = jax.random.normal(k1, (2, 16, 16), dtype=jnp.float32)
    label = jax.random.bernoulli(k2, 0.3, (2, 16, 16)).astype(jnp.int32)

    loss = binary_focal_loss_logits(logits, label, alpha=ALPHA, gamma=GAMMA)
    loss = jax.block_until_ready(loss)

    # pure-JAX reference check
    sig = jax.nn.sigmoid(logits)
    p_ref = jnp.where(label == 1, sig, 1.0 - sig) + 1e-10
    a_ref = jnp.where(label == 1, ALPHA, 1.0 - ALPHA)
    ref = jnp.mean(-a_ref * jnp.power(1.0 - p_ref, GAMMA) * jnp.log(p_ref))
    assert jnp.allclose(loss, ref, rtol=1e-5, atol=1e-6), (loss, ref)

    print("KERNEL_OK")
</pallas_src>

<mosaic_0001>
module attributes {stable_mosaic.version = 11 : i64} {
  func.func @_focal_loss_kernel(%arg0: i32, %arg1: memref<32x128xf32, #tpu.memory_space<vmem>>, %arg2: memref<32x128xi8, #tpu.memory_space<vmem>>, %arg3: memref<1x8x128xf32, #tpu.memory_space<vmem>>) attributes {dimension_semantics = [#tpu.dimension_semantics<parallel>], iteration_bounds = array<i64: 1>, scalar_prefetch = 0 : i64, scratch_operands = 0 : i64, tpu.core_type = #tpu.core_type<tc>, window_params = [{transform_indices = @transform_0, window_bounds = array<i64: 32, 128>}, {transform_indices = @transform_1, window_bounds = array<i64: 32, 128>}, {transform_indices = @transform_2, window_bounds = array<i64: 1, 8, 128>}]} {
    %c0 = arith.constant 0 : index
    %c0_0 = arith.constant 0 : index
    %0 = vector.load %arg1[%c0, %c0_0] : memref<32x128xf32, #tpu.memory_space<vmem>>, vector<32x128xf32>
    %c0_1 = arith.constant 0 : index
    %c0_2 = arith.constant 0 : index
    %1 = vector.load %arg2[%c0_1, %c0_2] : memref<32x128xi8, #tpu.memory_space<vmem>>, vector<32x128xi8>
    %2 = arith.sitofp %1 : vector<32x128xi8> to vector<32x128xf32>
    %cst = arith.constant 0.000000e+00 : f32
    %3 = vector.broadcast %cst : f32 to vector<32x128xf32>
    %4 = arith.cmpf one, %2, %3 : vector<32x128xf32>
    %c4096_i32 = arith.constant 4096 : i32
    %5 = arith.muli %arg0, %c4096_i32 : i32
    %6 = tpu.iota {dimensions = array<i32: 0>} : vector<32x128xi32>
    %7 = tpu.iota {dimensions = array<i32: 1>} : vector<32x128xi32>
    %c128_i32 = arith.constant 128 : i32
    %8 = vector.broadcast %c128_i32 : i32 to vector<32x128xi32>
    %9 = arith.muli %6, %8 : vector<32x128xi32>
    %10 = vector.broadcast %5 : i32 to vector<32x128xi32>
    %11 = arith.addi %10, %9 : vector<32x128xi32>
    %12 = arith.addi %11, %7 : vector<32x128xi32>
    %c512_i32 = arith.constant 512 : i32
    %13 = vector.broadcast %c512_i32 : i32 to vector<32x128xi32>
    %14 = arith.cmpi slt, %12, %13 : vector<32x128xi32>
    %15 = arith.negf %0 : vector<32x128xf32>
    %16 = math.exp %15 : vector<32x128xf32>
    %cst_3 = arith.constant 1.000000e+00 : f32
    %17 = vector.broadcast %cst_3 : f32 to vector<32x128xf32>
    %18 = arith.addf %17, %16 : vector<32x128xf32>
    %19 = arith.divf %17, %18 : vector<32x128xf32>
    %cst_4 = arith.constant 1.000000e+00 : f32
    %20 = vector.broadcast %cst_4 : f32 to vector<32x128xf32>
    %21 = arith.subf %20, %19 : vector<32x128xf32>
    %22 = arith.select %4, %19, %21 : vector<32x128xi1>, vector<32x128xf32>
    %cst_5 = arith.constant 1.000000e-10 : f32
    %23 = vector.broadcast %cst_5 : f32 to vector<32x128xf32>
    %24 = arith.addf %22, %23 : vector<32x128xf32>
    %cst_6 = arith.constant 2.500000e-01 : f32
    %cst_7 = arith.constant 7.500000e-01 : f32
    %25 = vector.broadcast %cst_6 : f32 to vector<32x128xf32>
    %26 = vector.broadcast %cst_7 : f32 to vector<32x128xf32>
    %27 = arith.select %4, %25, %26 : vector<32x128xi1>, vector<32x128xf32>
    %cst_8 = arith.constant 1.000000e+00 : f32
    %28 = vector.broadcast %cst_8 : f32 to vector<32x128xf32>
    %29 = arith.subf %28, %24 : vector<32x128xf32>
    %30 = arith.mulf %29, %29 : vector<32x128xf32>
    %cst_9 = arith.constant 0.000000e+00 : f32
    %31 = vector.broadcast %cst_9 : f32 to vector<32x128xf32>
    %32 = arith.subf %31, %27 : vector<32x128xf32>
    %33 = arith.mulf %32, %30 : vector<32x128xf32>
    %34 = math.log %24 : vector<32x128xf32>
    %35 = arith.mulf %33, %34 : vector<32x128xf32>
    %cst_10 = arith.constant 0.000000e+00 : f32
    %36 = vector.broadcast %cst_10 : f32 to vector<32x128xf32>
    %37 = arith.select %14, %35, %36 : vector<32x128xi1>, vector<32x128xf32>
    %38 = vector.shape_cast %37 : vector<32x128xf32> to vector<4x8x128xf32>
    %cst_11 = arith.constant dense<0.000000e+00> : vector<8x128xf32>
    %39 = vector.multi_reduction <add>, %38, %cst_11 [0] : vector<4x8x128xf32> to vector<8x128xf32>
    %c0_12 = arith.constant 0 : index
    %c0_13 = arith.constant 0 : index
    %c0_14 = arith.constant 0 : index
    %40 = vector.load %arg3[%c0_12, %c0_13, %c0_14] : memref<1x8x128xf32, #tpu.memory_space<vmem>>, vector<1x8x128xf32>
    %41 = vector.shape_cast %40 : vector<1x8x128xf32> to vector<8x128xf32>
    %42 = vector.shape_cast %39 : vector<8x128xf32> to vector<1x8x128xf32>
    tpu.vector_store %arg3[%c0_12, %c0_13, %c0_14], %42 {strides = array<i32>} : memref<1x8x128xf32, #tpu.memory_space<vmem>>, vector<1x8x128xf32>,
    return
  }
  func.func @transform_0(%arg0: i32) -> (i32, i32) {
    %c0_i32 = arith.constant 0 : i32
    %c0_i32_0 = arith.constant 0 : i32
    return %arg0, %c0_i32 : i32, i32
  }
  func.func @transform_1(%arg0: i32) -> (i32, i32) {
    %c0_i32 = arith.constant 0 : i32
    %c0_i32_0 = arith.constant 0 : i32
    return %arg0, %c0_i32 : i32, i32
  }
  func.func @transform_2(%arg0: i32) -> (i32, i32, i32) {
    %c0_i32 = arith.constant 0 : i32
    %c0_i32_0 = arith.constant 0 : i32
    %c0_i32_1 = arith.constant 0 : i32
    return %arg0, %c0_i32, %c0_i32_0 : i32, i32, i32
  }
}

</mosaic_0001>

<bundles_post_ra>
// kernel: tpu_custom_call.1
= control target key start
LH: loop header
LB: loop body
LE: loop exit
PB: predicated region body
PF: predicated region fallthrough
CT: control target
= control target key end

     0   :  { %7 = vsyncpa [#allocation3], 0  ;;  %s479_s0 = inlined_call_operand.hbm [shape: f32[32,128], index: 0, kind: input, shape index: {}]   ;;  %s480_s1 = inlined_call_operand.hbm [shape: s8[32,128], index: 1, kind: input, shape index: {}]   ;;  %s481_s2 = inlined_call_operand.hbm [shape: f32[1,8,128], index: 2, kind: output, shape index: {}]  }
   0x1   :  { %8 = vsyncpa [#allocation6], 0 }
   0x2   :  { %9 = vsyncpa [#allocation4], 0  ;;  %s14_s11 = sshll.u32 %s479_s0, 4  ;;  %s342_s12 = smov [#allocation2]   ;;  %s15_s11 = int_to_ptr.hbm [resolvable:$true] %s14_s11 }
   0x3   :  { %s16_s13 = sshll.u32 %s342_s12, 4  ;;  %s28_s16 = sshll.u32 %s480_s1, 4  ;;  %s17_s13 = int_to_ptr.vmem [resolvable:$true] %s16_s13  ;;  %s29_s16 = int_to_ptr.hbm [resolvable:$true] %s28_s16 }
   0x4   :  { %s343_s17 = smov 128   ;;  %s344_s18 = smov 8  }
   0x5   :  { %22 = dma.hbm_to_vmem [thread:$0]  %s15_s11, 512, %s17_s13, [#allocation3], %s343_s17, %s343_s17, %s344_s18  }
   0x6   :  { %s345_s19 = smov [#allocation5]  }
   0x7   :  { %s30_s20 = sshll.u32 %s345_s19, 4  ;;  %s31_s20 = int_to_ptr.vmem [resolvable:$true] %s30_s20 }
   0x8   :  { %33 = dma.hbm_to_vmem [thread:$0]  %s29_s16, 128, %s31_s20, [#allocation6]  }
   0x9   :  { %336 = dma.done.wait [#allocation3], 512  }
   0xa   :  { %337 = vsyncadd [#allocation3], 4294966784 }
   0xb   :  { %338 = dma.done.wait [#allocation6], 128  }
   0xc   :  { %339 = vsyncadd [#allocation6], 4294967168  ;;  %v42_v0 = vld [vmem:[#allocation2] sm:$0xff]  ;;  %v43_v1 = vld [vmem:[#allocation2 + $0x8] sm:$0xff]  ;;  %v60_v8 = vlaneseq  ;;  %s347_s0 = smov [#allocation7]   ;;  %s219_s23 = sshll.u32 %s481_s2, 4  ;;  %s220_s23 = int_to_ptr.hbm [resolvable:$true] %s219_s23 }
   0xd   :  { %v44_v2 = vld [vmem:[#allocation2 + $0x10] sm:$0xff]  ;;  %v45_v3 = vld [vmem:[#allocation2 + $0x18] sm:$0xff]  ;;  %v230_v4 = vmul.f32 -1.442695, %v42_v0  ;;  %v231_v5 = vmul.f32 -1.442695, %v43_v1 }
   0xe   :  { %v232_v6 = vmul.f32 -1.442695, %v44_v2  ;;  %v233_v7 = vmul.f32 -1.442695, %v45_v3  ;;  %v46_v10 = vld [vmem:[#allocation5] sm:$0xff]  ;;  %v369_v11 = vshrl.u32 %v60_v8, 7 }
   0xf   :  { %240 = vpow2.f32 %v230_v4  ;;  %v47_v15 = vunpack.c.0.s8 %v46_v10  ;;  %v48_v22 = vunpack.c.1.s8 %v46_v10  ;;  %v49_v23 = vunpack.c.2.s8 %v46_v10  ;;  %s217_s1 = sshll.u32 %s347_s0, 4  ;;  %s218_s1 = int_to_ptr.vmem [resolvable:$true] %s217_s1 }
  0x10   :  { %242 = vpow2.f32 %v231_v5  ;;  %v372_v18 = vadd.s32 8, %v369_v11  ;;  %v375_v19 = vadd.s32 16, %v369_v11  ;;  %v378_v20 = vadd.s32 24, %v369_v11 }
  0x11   :  { %244 = vpow2.f32 %v232_v6  ;;  %v50_v25 = vunpack.c.3.s8 %v46_v10  ;;  %v385_v27 = vcvt.s32.f32 %v47_v15  ;;  %v388_v29 = vand.u32 127, %v60_v8 }
  0x12   :  { %246 = vpow2.f32 %v233_v7  ;;  %v67_v30 = vmul.u32 128, %v369_v11  ;;  %v68_v31 = vmul.u32 128, %v372_v18  ;;  %v392_v33 = vcvt.s32.f32 %v48_v22 }
  0x13   :  { %v394_v34 = vcvt.s32.f32 %v49_v23  ;;  %v69_v35 = vmul.u32 128, %v375_v19  ;;  %v70_v36 = vmul.u32 128, %v378_v20  ;;  %v398_v37 = vcvt.s32.f32 %v50_v25 }
  0x14   :  { %vm55_vm2 = vcmp.ne.f32.partialorder %v385_v27, 0.0  ;;  %vm56_vm6 = vcmp.ne.f32.partialorder %v392_v33, 0.0  ;;  %v346_v25 = vmov 0.75  }
  0x15   :  { %v241_v9 = vpop.eup %240  ;;  %v78_v11 = vadd.s32 %v69_v35, %v388_v29 }
  0x16   :  { %v96_v12 = vadd.f32 1.0, %v241_v9  ;;  %v243_v13 = vpop.eup %242 }
  0x17   :  { %v245_v14 = vpop.eup %244  ;;  %v97_v16 = vadd.f32 1.0, %v243_v13 }
  0x18   :  { %248 = vrcp.f32 %v96_v12  ;;  %v247_v17 = vpop.eup %246  ;;  %v380_v21 = vadd.f32 1.0, %v245_v14  ;;  %v109_v26 = vand.u32 2147483647, %v96_v12  ;;  %v111_v28 = vand.u32 2147483648, %v96_v12 }
  0x19   :  { %v382_v24 = vadd.f32 1.0, %v247_v17  ;;  %250 = vrcp.f32 %v97_v16  ;;  %vm105_vm0 = vweird.f32 %v96_v12  ;;  %vm120_vm3 = vweird.f32 %v97_v16 }
  0x1a   :  { %252 = vrcp.f32 %v380_v21  ;;  %vm400_vm1 = vcmp.eq.f32.partialorder %v109_v26, 8.507059e+37  ;;  %v112_v41 = vor.u32 1.1754944e-38, %v111_v28  ;;  %v124_v42 = vand.u32 2147483647, %v97_v16 }
  0x1b   :  { %254 = vrcp.f32 %v382_v24  ;;  %v126_v43 = vand.u32 2147483648, %v97_v16  ;;  %vm135_vm5 = vweird.f32 %v380_v21  ;;  %v139_v49 = vand.u32 2147483647, %v380_v21 }
  0x1c   :  { %v141_v50 = vand.u32 2147483648, %v380_v21  ;;  %vm150_vm7 = vweird.f32 %v382_v24  ;;  %v154_v56 = vand.u32 2147483647, %v382_v24  ;;  %v156_v57 = vand.u32 2147483648, %v382_v24 }
  0x1d   :  { %vm424_vm13 = vcmp.eq.f32.partialorder %v124_v42, 8.507059e+37  ;;  %v127_v63 = vor.u32 1.1754944e-38, %v126_v43  ;;  %vm140_vm15 = vcmp.eq.f32.partialorder %v139_v49, 8.507059e+37  ;;  %v172_v26 = vsel %vm55_vm2, 0.25, %v346_v25 }
  0x1e   :  { %v249_v32 = vpop.eup %248  ;;  %v142_v4 = vor.u32 1.1754944e-38, %v141_v50  ;;  %v157_v8 = vor.u32 1.1754944e-38, %v156_v57 }
  0x1f   :  { %v101_v38 = vmul.f32 %v249_v32, %v96_v12  ;;  %v251_v40 = vpop.eup %250  ;;  %vm106_vm4 = vweird.f32 %v249_v32 }
  0x20   :  { %v253_v44 = vpop.eup %252  ;;  %v116_v46 = vmul.f32 %v251_v40, %v97_v16  ;;  %vm121_vm8 = vweird.f32 %v251_v40  ;;  %vm413_vm9 = vmor %vm105_vm0, %vm106_vm4  ;;  %vm57_vm4 = vcmp.ne.f32.partialorder %v394_v34, 0.0  ;;  %v76_v34 = vadd.s32 %v67_v30, %v388_v29 }
  0x21   :  { %v102_v45 = vsub.f32 1.0, %v101_v38  ;;  %v255_v47 = vpop.eup %254  ;;  %v131_v48 = vmul.f32 %v253_v44, %v380_v21  ;;  %vm136_vm10 = vweird.f32 %v253_v44  ;;  %vm420_vm12 = vmor %vm120_vm3, %vm121_vm8  ;;  %vm155_vm3 = vcmp.eq.f32.partialorder %v154_v56, 8.507059e+37 }
  0x22   :  { %v117_v52 = vsub.f32 1.0, %v116_v46  ;;  %v146_v53 = vmul.f32 %v255_v47, %v382_v24  ;;  %vm151_vm11 = vweird.f32 %v255_v47  ;;  %vm432_vm14 = vmor %vm135_vm5, %vm136_vm10  ;;  %vm58_vm5 = vcmp.ne.f32.partialorder %v398_v37, 0.0 }
  0x23   :  { %v103_v51 = vmul.f32 %v249_v32, %v102_v45  ;;  %v132_v55 = vsub.f32 1.0, %v131_v48  ;;  %vm152_vm0 = vmor %vm150_vm7, %vm151_vm11  ;;  %v173_v38 = vsel %vm56_vm6, 0.25, %v346_v25  ;;  %v174_v39 = vsel %vm57_vm4, 0.25, %v346_v25 }
  0x24   :  { %v118_v59 = vmul.f32 %v251_v40, %v117_v52  ;;  %v147_v60 = vsub.f32 1.0, %v146_v53  ;;  %v184_v45 = vsub.f32 0.0, %v172_v26  ;;  %v185_v49 = vsub.f32 0.0, %v173_v38 }
  0x25   :  { %v104_v58 = vadd.f32 %v249_v32, %v103_v51  ;;  %v133_v0 = vmul.f32 %v253_v44, %v132_v55  ;;  %v186_v52 = vsub.f32 0.0, %v174_v39  ;;  %v77_v56 = vadd.s32 %v68_v31, %v388_v29 }
  0x26   :  { %v119_v2 = vadd.f32 %v251_v40, %v118_v59  ;;  %v148_v5 = vmul.f32 %v255_v47, %v147_v60  ;;  %v79_v60 = vadd.s32 %v70_v36, %v388_v29 }
  0x27   :  { %v108_v1 = vsel %vm413_vm9, %v249_v32, %v104_v58  ;;  %v134_v7 = vadd.f32 %v253_v44, %v133_v0 }
  0x28   :  { %v113_v6 = vsel %vm400_vm1, %v112_v41, %v108_v1  ;;  %v123_v9 = vsel %vm420_vm12, %v251_v40, %v119_v2  ;;  %v149_v10 = vadd.f32 %v255_v47, %v148_v5  ;;  %vm80_vm1 = vcmp.lt.s32.totalorder %v76_v34, 512 }
  0x29   :  { %v160_v12 = vsub.f32 1.0, %v113_v6  ;;  %v128_v13 = vsel %vm424_vm13, %v127_v63, %v123_v9  ;;  %v138_v14 = vsel %vm432_vm14, %v253_v44, %v134_v7  ;;  %v175_v44 = vsel %vm58_vm5, 0.25, %v346_v25 }
  0x2a   :  { %v143_v15 = vsel %vm140_vm15, %v142_v4, %v138_v14  ;;  %v153_v16 = vsel %vm152_vm0, %v255_v47, %v149_v10  ;;  %v161_v17 = vsub.f32 1.0, %v128_v13  ;;  %v187_v54 = vsub.f32 0.0, %v175_v44 }
  0x2b   :  { %v164_v21 = vsel %vm55_vm2, %v113_v6, %v160_v12  ;;  %v158_v22 = vsel %vm155_vm3, %v157_v8, %v153_v16  ;;  %v162_v23 = vsub.f32 1.0, %v143_v15  ;;  %vm81_vm2 = vcmp.lt.s32.totalorder %v77_v56, 512 }
  0x2c   :  { %v168_v24 = vadd.f32 1e-10, %v164_v21  ;;  %v163_v28 = vsub.f32 1.0, %v158_v22  ;;  %v165_v32 = vsel %vm56_vm6, %v128_v13, %v161_v17  ;;  %vm82_vm6 = vcmp.lt.s32.totalorder %v78_v11, 512 }
  0x2d   :  { %v166_v40 = vsel %vm57_vm4, %v143_v15, %v162_v23  ;;  %v169_v41 = vadd.f32 1e-10, %v165_v32  ;;  %vm83_vm7 = vcmp.lt.s32.totalorder %v79_v60, 512 }
  0x2e   :  { %v176_v42 = vsub.f32 1.0, %v168_v24  ;;  %256 = vlog2.f32 %v168_v24  ;;  %v167_v27 = vsel %vm58_vm5, %v158_v22, %v163_v28  ;;  %v170_v43 = vadd.f32 1e-10, %v166_v40 }
  0x2f   :  { %v171_v46 = vadd.f32 1e-10, %v167_v27  ;;  %v177_v33 = vsub.f32 1.0, %v169_v41  ;;  %258 = vlog2.f32 %v169_v41 }
  0x30   :  { %v180_v47 = vmul.f32 %v176_v42, %v176_v42  ;;  %v178_v48 = vsub.f32 1.0, %v170_v43  ;;  %260 = vlog2.f32 %v170_v43 }
  0x31   :  { %v179_v50 = vsub.f32 1.0, %v171_v46  ;;  %v181_v51 = vmul.f32 %v177_v33, %v177_v33  ;;  %262 = vlog2.f32 %v171_v46 }
  0x32   :  { %v182_v53 = vmul.f32 %v178_v48, %v178_v48  ;;  %v188_v37 = vmul.f32 %v184_v45, %v180_v47 }
  0x33   :  { %v183_v57 = vmul.f32 %v179_v50, %v179_v50  ;;  %v189_v30 = vmul.f32 %v185_v49, %v181_v51 }
  0x34   :  { %v257_v55 = vpop.eup %256  ;;  %v190_v61 = vmul.f32 %v186_v52, %v182_v53 }
  0x35   :  { %v193_v58 = vmul.f32 0.6931472, %v257_v55  ;;  %v259_v59 = vpop.eup %258  ;;  %v191_v63 = vmul.f32 %v187_v54, %v183_v57 }
  0x36   :  { %v261_v62 = vpop.eup %260  ;;  %v195_v0 = vmul.f32 0.6931472, %v259_v59 }
  0x37   :  { %v200_v1 = vmul.f32 %v193_v58, %v188_v37  ;;  %v263_v18 = vpop.eup %262  ;;  %v197_v31 = vmul.f32 0.6931472, %v261_v62 }
  0x38   :  { %v199_v2 = vmul.f32 0.6931472, %v263_v18  ;;  %v201_v19 = vmul.f32 %v195_v0, %v189_v30 }
  0x39   :  { %v204_v35 = vsel %vm80_vm1, %v200_v1, 0.0  ;;  %v202_v3 = vmul.f32 %v197_v31, %v190_v61 }
  0x3a   :  { %v203_v4 = vmul.f32 %v199_v2, %v191_v63  ;;  %v205_v5 = vsel %vm81_vm2, %v201_v19, 0.0 }
  0x3b   :  { %v206_v6 = vsel %vm82_vm6, %v202_v3, 0.0  ;;  %v208_v20 = vadd.f32 %v205_v5, %v204_v35 }
  0x3c   :  { %v207_v29 = vsel %vm83_vm7, %v203_v4, 0.0 }
  0x3d   :  { %v209_v36 = vadd.f32 %v208_v20, %v206_v6 }
  0x3f   :  { %v210_v7 = vadd.f32 %v209_v36, %v207_v29 }
  0x41   :  { %211 = vst [vmem:[#allocation7] sm:$0xff] %v210_v7 }
  0x42   :  { %222 = dma.vmem_to_hbm [thread:$0]  %s218_s1, 128, %s220_s23, [#allocation4]  }
  0x43   :  { %340 = dma.done.wait [#allocation4], 128  }
  0x44   :  { %341 = vsyncadd [#allocation4], 4294967168 }
  0x45   :  { %227 = vsyncpa [#allocation3], 1 }
  0x46   :  { %228 = vsyncpa [#allocation6], 1 }
  0x47   :  { %229 = vsyncpa [#allocation4], 1 }

</bundles_post_ra>
